<compile_context>
chip_gen: v7x
topology: tpu7x:2x2x1
jax: 0.10.0
libtpu: 0.0.40
codegen_flags: <defaults>
</compile_context>

<pallas_src>
import functools

import jax
import jax.numpy as jnp
from jax.experimental import pallas as pl
from jax.experimental.pallas import tpu as pltpu


def _wrmse_kernel(yp_ref, yt_ref, o_ref, acc_ref, *,
                  total_rows, row_tile, tiles_per_core, tail_start):
    c = pl.program_id(0)   # TensorCore shard (size 1 on single-TC chips)
    i = pl.program_id(1)   # sequential tile index within the shard

    @pl.when(i == 0)
    def _():
        acc_ref[...] = jnp.zeros_like(acc_ref)

    yt = yt_ref[...].astype(jnp.float32)
    yp = yp_ref[...].astype(jnp.float32)

    # Numerically stable softmax pieces over the lane (last) axis; the
    # normalized weights are never materialized:
    #   sum_j w_j * d_j^2 == sum_j e_j * d_j^2 / sum_j e_j
    a = jnp.abs(yt)
    m = jnp.max(a, axis=-1, keepdims=True)
    e = jnp.exp(a - m)
    d = yt - yp
    num = jnp.sum(e * (d * d), axis=-1, keepdims=True)   # (row_tile, 1)
    den = jnp.sum(e, axis=-1, keepdims=True)              # (row_tile, 1)
    contrib = num / den                                    # per-row weighted SSE

    if tail_start is None:
        # Static fast path: every tile is full and in-range -> no masking work
        # anywhere in the loop.
        acc_ref[...] += contrib
    else:
        # Only tiles at/after `tail_start` can hold rows past `total_rows`
        # (the partial last tile and, with the core split, phantom tiles on
        # the last core).  Keep the lane-sparse iota/where tail out of the
        # steady state.
        t = c * tiles_per_core + i            # global tile index (may be phantom)

        @pl.when(t < tail_start)
        def _():
            acc_ref[...] += contrib

        @pl.when(t >= tail_start)
        def _():
            row_ids = t * row_tile + jax.lax.broadcasted_iota(
                jnp.int32, (row_tile, 1), 0)
            acc_ref[...] += jnp.where(row_ids < total_rows, contrib,
                                      jnp.float32(0.0))

    @pl.when(i == tiles_per_core - 1)
    def _():
        # Per-core partial sum of weighted squared error, broadcast across the
        # (1, 8, 128) output block; the wrapper reads element [c, 0, 0].
        o_ref[...] = jnp.broadcast_to(jnp.sum(acc_ref[...]), o_ref.shape)


def _round_up(x, m):
    return ((x + m - 1) // m) * m


def _tensorcores_per_chip():
    # v7x has 2 TensorCores per chip; v5e/v6e have 1.  Only v7x benefits from
    # the core split, so gate on device kind.
    # TODO(synk): switch to a pltpu.get_tpu_info() core-count query once the
    # field name is stable.
    try:
        kind = (getattr(jax.devices()[0], "device_kind", "") or "").lower()
    except Exception:
        return 1
    return 2 if "v7" in kind else 1


def weighted_rmse_loss(y_pred, y_true, *, row_tile=None, num_cores=None):
    assert y_pred.shape == y_true.shape, "y_pred / y_true shape mismatch"
    D = y_true.shape[-1]
    yp2 = y_pred.reshape(-1, D)
    yt2 = y_true.reshape(-1, D)
    R = yp2.shape[0]
    total_n = R * D  # mean over ALL elements (matches torch.mean)
    itemsize = jnp.dtype(y_true.dtype).itemsize

    if num_cores is None:
        num_cores = _tensorcores_per_chip()

    if row_tile is None:
        # Memory-bound streaming kernel: size the tile against the in-kernel
        # working set (2 inputs x 2 pipeline buffers at the input itemsize,
        # ~6 full-tile f32 temporaries/casts, and the lane-padded (rows, 128)
        # f32 accumulator), targeting ~24 MiB under the 32 MiB scoped-VMEM
        # limit requested below.  32 MiB scoped is safe on every generation
        # (v5e/v6e 128 MiB physical, v7x 64 MiB per TensorCore).
        per_row_bytes = 4 * itemsize * D + 24 * D + 4 * 128
        row_tile = max(16, (24 << 20) // per_row_bytes)
    row_tile = min(row_tile, _round_up(R, 16), 8192)
    row_tile = max(16, (row_tile // 16) * 16)   # sublane packing (f32 & bf16)

    num_tiles = pl.cdiv(R, row_tile)
    tiles_per_core = pl.cdiv(num_tiles, num_cores)
    covered_tiles = num_cores * tiles_per_core

    has_partial = (R % row_tile) != 0
    has_phantom = covered_tiles > num_tiles
    if has_partial:
        tail_start = num_tiles - 1
    elif has_phantom:
        tail_start = num_tiles
    else:
        tail_start = None   # static: no masking code emitted at all

    if has_phantom:
        # Clamp phantom tiles (last core, odd tile count) onto the last real
        # tile so the auto-DMA stays in bounds; the kernel masks them to zero.
        def in_map(c, i):
            return (jnp.minimum(c * tiles_per_core + i, num_tiles - 1), 0)
    else:
        def in_map(c, i):
            return (c * tiles_per_core + i, 0)

    kernel = functools.partial(
        _wrmse_kernel,
        total_rows=R, row_tile=row_tile,
        tiles_per_core=tiles_per_core, tail_start=tail_start,
    )

    partials = pl.pallas_call(
        kernel,
        out_shape=jax.ShapeDtypeStruct((num_cores, 8, 128), jnp.float32),
        grid_spec=pltpu.PrefetchScalarGridSpec(
            num_scalar_prefetch=0,
            grid=(num_cores, tiles_per_core),
            in_specs=[
                pl.BlockSpec((row_tile, D), in_map),
                pl.BlockSpec((row_tile, D), in_map),
            ],
            out_specs=pl.BlockSpec((1, 8, 128), lambda c, i: (c, 0, 0)),
            scratch_shapes=[pltpu.VMEM((row_tile, 1), jnp.float32)],
        ),
        compiler_params=pltpu.CompilerParams(
            # Leading core axis shards across TensorCores on v7x; the tile
            # axis is a sequential reduction into the per-core accumulator.
            dimension_semantics=("parallel", "arbitrary"),
            vmem_limit_bytes=32 << 20,
        ),
        cost_estimate=pl.CostEstimate(
            flops=10 * R * D,
            transcendentals=R * D,
            bytes_accessed=2 * R * D * itemsize + num_cores * 8 * 128 * 4,
        ),
    )(yp2, yt2)

    # Final reduce / mean / sqrt over the per-core partials in the wrapper.
    total_sse = jnp.sum(partials[:, 0, 0])
    return jnp.sqrt(total_sse * jnp.float32(1.0 / float(total_n)))


def _reference(y_pred, y_true):
    # Pure-JAX reference of the PyTorch forward.
    a = jnp.abs(y_true)
    w = jax.nn.softmax(a, axis=-1)
    return jnp.sqrt(jnp.mean(w * (y_true - y_pred) ** 2))


if __name__ == "__main__":
    key = jax.random.PRNGKey(0)
    ks = jax.random.split(key, 10)

    # Case 1: (B, S, D) with the softmax axis D on the 128-wide lane axis.
    y_pred = jax.random.normal(ks[0], (2, 8, 128), dtype=jnp.float32)
    y_true = jax.random.normal(ks[1], (2, 8, 128), dtype=jnp.float32)
    loss = jax.block_until_ready(weighted_rmse_loss(y_pred, y_true))
    ref = _reference(y_pred, y_true)
    assert jnp.allclose(loss, ref, rtol=1e-5, atol=1e-6), (loss, ref)

    # Case 2: row count not divisible by the row tile (partial-tile mask path).
    y_pred2 = jax.random.normal(ks[2], (3, 5, 128), dtype=jnp.float32)
    y_true2 = jax.random.normal(ks[3], (3, 5, 128), dtype=jnp.float32)
    loss2 = jax.block_until_ready(weighted_rmse_loss(y_pred2, y_true2))
    ref2 = _reference(y_pred2, y_true2)
    assert jnp.allclose(loss2, ref2, rtol=1e-5, atol=1e-6), (loss2, ref2)

    # Case 3: multi-tile grid (steady-state unmasked path + masked tail tile)
    # via an explicit small row_tile so the shapes stay small.
    y_pred3 = jax.random.normal(ks[4], (16, 40, 128), dtype=jnp.float32)
    y_true3 = jax.random.normal(ks[5], (16, 40, 128), dtype=jnp.float32)
    loss3 = jax.block_until_ready(weighted_rmse_loss(y_pred3, y_true3, row_tile=256))
    ref3 = _reference(y_pred3, y_true3)
    assert jnp.allclose(loss3, ref3, rtol=1e-4, atol=1e-6), (loss3, ref3)

    # Case 4: explicit 2-core split structure (runs sequentially on a
    # single-TC chip, shards across TensorCores on v7x); odd tile count also
    # exercises the clamped phantom-tile path.
    loss4 = jax.block_until_ready(
        weighted_rmse_loss(y_pred3, y_true3, row_tile=256, num_cores=2))
    assert jnp.allclose(loss4, ref3, rtol=1e-4, atol=1e-6), (loss4, ref3)

    # Case 5: bf16 inputs (half the HBM byte stream; f32 in-register compute).
    y_pred5 = jax.random.normal(ks[6], (4, 6, 128), dtype=jnp.float32).astype(jnp.bfloat16)
    y_true5 = jax.random.normal(ks[7], (4, 6, 128), dtype=jnp.float32).astype(jnp.bfloat16)
    loss5 = jax.block_until_ready(weighted_rmse_loss(y_pred5, y_true5))
    ref5 = _reference(y_pred5.astype(jnp.float32), y_true5.astype(jnp.float32))
    assert jnp.allclose(loss5, ref5, rtol=1e-4, atol=1e-5), (loss5, ref5)

    print("KERNEL_OK")
</pallas_src>

<mosaic_0001>
module attributes {stable_mosaic.version = 11 : i64} {
  func.func @_wrmse_kernel(%arg0: i32, %arg1: i32, %arg2: memref<16x128xf32, #tpu.memory_space<vmem>>, %arg3: memref<16x128xf32, #tpu.memory_space<vmem>>, %arg4: memref<1x8x128xf32, #tpu.memory_space<vmem>>, %arg5: memref<16x1xf32, #tpu.memory_space<vmem>>) attributes {dimension_semantics = [#tpu.dimension_semantics<parallel>, #tpu.dimension_semantics<arbitrary>], iteration_bounds = array<i64: 1, 1>, scalar_prefetch = 0 : i64, scratch_operands = 1 : i64, tpu.core_type = #tpu.core_type<tc>, window_params = [{transform_indices = @transform_0, window_bounds = array<i64: 16, 128>}, {transform_indices = @transform_1, window_bounds = array<i64: 16, 128>}, {transform_indices = @transform_2, window_bounds = array<i64: 1, 8, 128>}]} {
    %c0_i32 = arith.constant 0 : i32
    %0 = arith.cmpi eq, %arg1, %c0_i32 : i32
    %1 = arith.extui %0 : i1 to i32
    %c0_i32_0 = arith.constant 0 : i32
    %2 = arith.cmpi ne, %1, %c0_i32_0 : i32
    scf.if %2 {
      %cst_12 = arith.constant 0.000000e+00 : f32
      %25 = vector.broadcast %cst_12 : f32 to vector<16x1xf32>
      %c0_13 = arith.constant 0 : index
      %c0_14 = arith.constant 0 : index
      %26 = vector.load %arg5[%c0_13, %c0_14] : memref<16x1xf32, #tpu.memory_space<vmem>>, vector<16x1xf32>
      tpu.vector_store %arg5[%c0_13, %c0_14], %25 {strides = array<i32>} : memref<16x1xf32, #tpu.memory_space<vmem>>, vector<16x1xf32>,
    } else {
    }
    %c0 = arith.constant 0 : index
    %c0_1 = arith.constant 0 : index
    %3 = vector.load %arg3[%c0, %c0_1] : memref<16x128xf32, #tpu.memory_space<vmem>>, vector<16x128xf32>
    %c0_2 = arith.constant 0 : index
    %c0_3 = arith.constant 0 : index
    %4 = vector.load %arg2[%c0_2, %c0_3] : memref<16x128xf32, #tpu.memory_space<vmem>>, vector<16x128xf32>
    %5 = math.absf %3 : vector<16x128xf32>
    %cst = arith.constant dense<0xFF800000> : vector<16xf32>
    %6 = vector.multi_reduction <maximumf>, %5, %cst [1] : vector<16x128xf32> to vector<16xf32>
    %7 = vector.shape_cast %6 : vector<16xf32> to vector<16x1xf32>
    %8 = vector.broadcast %7 : vector<16x1xf32> to vector<16x128xf32>
    %9 = arith.subf %5, %8 : vector<16x128xf32>
    %10 = math.exp %9 : vector<16x128xf32>
    %11 = arith.subf %3, %4 : vector<16x128xf32>
    %12 = arith.mulf %11, %11 : vector<16x128xf32>
    %13 = arith.mulf %10, %12 : vector<16x128xf32>
    %cst_4 = arith.constant dense<0.000000e+00> : vector<16xf32>
    %14 = vector.multi_reduction <add>, %13, %cst_4 [1] : vector<16x128xf32> to vector<16xf32>
    %15 = vector.shape_cast %14 : vector<16xf32> to vector<16x1xf32>
    %cst_5 = arith.constant dense<0.000000e+00> : vector<16xf32>
    %16 = vector.multi_reduction <add>, %10, %cst_5 [1] : vector<16x128xf32> to vector<16xf32>
    %17 = vector.shape_cast %16 : vector<16xf32> to vector<16x1xf32>
    %18 = arith.divf %15, %17 : vector<16x1xf32>
    %c0_6 = arith.constant 0 : index
    %c0_7 = arith.constant 0 : index
    %19 = vector.load %arg5[%c0_6, %c0_7] : memref<16x1xf32, #tpu.memory_space<vmem>>, vector<16x1xf32>
    %20 = arith.addf %19, %18 : vector<16x1xf32>
    %c0_8 = arith.constant 0 : index
    %c0_9 = arith.constant 0 : index
    %21 = vector.load %arg5[%c0_8, %c0_9] : memref<16x1xf32, #tpu.memory_space<vmem>>, vector<16x1xf32>
    tpu.vector_store %arg5[%c0_8, %c0_9], %20 {strides = array<i32>} : memref<16x1xf32, #tpu.memory_space<vmem>>, vector<16x1xf32>,
    %c0_i32_10 = arith.constant 0 : i32
    %22 = arith.cmpi eq, %arg1, %c0_i32_10 : i32
    %23 = arith.extui %22 : i1 to i32
    %c0_i32_11 = arith.constant 0 : i32
    %24 = arith.cmpi ne, %23, %c0_i32_11 : i32
    scf.if %24 {
      %c0_12 = arith.constant 0 : index
      %c0_13 = arith.constant 0 : index
      %25 = vector.load %arg5[%c0_12, %c0_13] : memref<16x1xf32, #tpu.memory_space<vmem>>, vector<16x1xf32>
      %26 = vector.shape_cast %25 : vector<16x1xf32> to vector<1x16x1xf32>
      %cst_14 = arith.constant dense<0.000000e+00> : vector<1xf32>
      %27 = vector.multi_reduction <add>, %26, %cst_14 [1, 2] : vector<1x16x1xf32> to vector<1xf32>
      %28 = vector.shape_cast %27 : vector<1xf32> to vector<1x1x1xf32>
      %29 = vector.extract %28[0, 0, 0] : f32 from vector<1x1x1xf32>
      %30 = vector.broadcast %29 : f32 to vector<1x8x128xf32>
      %c0_15 = arith.constant 0 : index
      %c0_16 = arith.constant 0 : index
      %c0_17 = arith.constant 0 : index
      %31 = vector.load %arg4[%c0_15, %c0_16, %c0_17] : memref<1x8x128xf32, #tpu.memory_space<vmem>>, vector<1x8x128xf32>
      tpu.vector_store %arg4[%c0_15, %c0_16, %c0_17], %30 {strides = array<i32>} : memref<1x8x128xf32, #tpu.memory_space<vmem>>, vector<1x8x128xf32>,
    } else {
    }
    return
  }
  func.func @transform_0(%arg0: i32, %arg1: i32) -> (i32, i32) {
    %c1_i32 = arith.constant 1 : i32
    %0 = arith.muli %arg0, %c1_i32 : i32
    %1 = arith.addi %0, %arg1 : i32
    %c0_i32 = arith.constant 0 : i32
    %c0_i32_0 = arith.constant 0 : i32
    return %1, %c0_i32 : i32, i32
  }
  func.func @transform_1(%arg0: i32, %arg1: i32) -> (i32, i32) {
    %c1_i32 = arith.constant 1 : i32
    %0 = arith.muli %arg0, %c1_i32 : i32
    %1 = arith.addi %0, %arg1 : i32
    %c0_i32 = arith.constant 0 : i32
    %c0_i32_0 = arith.constant 0 : i32
    return %1, %c0_i32 : i32, i32
  }
  func.func @transform_2(%arg0: i32, %arg1: i32) -> (i32, i32, i32) {
    %c0_i32 = arith.constant 0 : i32
    %c0_i32_0 = arith.constant 0 : i32
    %c0_i32_1 = arith.constant 0 : i32
    return %arg0, %c0_i32, %c0_i32_0 : i32, i32, i32
  }
}

</mosaic_0001>

<bundles_post_ra>
// kernel: tpu_custom_call.1
= control target key start
LH: loop header
LB: loop body
LE: loop exit
PB: predicated region body
PF: predicated region fallthrough
CT: control target
= control target key end

     0   :  { %7 = vsyncpa [#allocation4], 0  ;;  %s286_s0 = inlined_call_operand.hbm [shape: f32[16,128], index: 0, kind: input, shape index: {}]   ;;  %s287_s1 = inlined_call_operand.hbm [shape: f32[16,128], index: 1, kind: input, shape index: {}]   ;;  %s288_s2 = inlined_call_operand.hbm [shape: f32[1,8,128], index: 2, kind: output, shape index: {}]  }
   0x1   :  { %8 = vsyncpa [#allocation7], 0 }
   0x2   :  { %9 = vsyncpa [#allocation5], 0  ;;  %s223_s9 = smov [#allocation3]   ;;  %s151_s13 = scalar_lea.hbm %s286_s0, 256 }
   0x3   :  { %s19_s10 = sshll.u32 %s223_s9, 4  ;;  %p152_p0 = scmp.ne.s32.totalorder %s286_s0, %s151_s13  ;;  %s20_s10 = int_to_ptr.vmem [resolvable:$true] %s19_s10 }
   0x4   :  { %p155_p1 = scmp.lt.u32.totalorder %s151_s13, %s286_s0 }
   0x6   :  { %p157_p2 = pnand %p155_p1, %p152_p0 }
   0x8   :  { %160 = shalt.err (!%p157_p2)
}
   0x9   :  { %s161_s18 = scalar_lea.vmem %s20_s10, 256  ;;  %p166_p4 = scmp.lt.s32.totalorder %s20_s10, %s20_s10 }
   0xa   :  { %p162_p3 = scmp.ne.s32.totalorder %s20_s10, %s161_s18  ;;  %p167_p5 = scmp.lt.s32.totalorder %s161_s18, %s161_s18 }
   0xc   :  { %p168_p6 = por %p167_p5, %p166_p4 }
   0xe   :  { %p169_p7 = pnand %p168_p6, %p162_p3 }
  0x10   :  { %172 = shalt.err (!%p169_p7)
}
  0x11   :  { %s224_s19 = smov 128   ;;  %s225_s20 = smov 8  }
  0x12   :  { %25 = dma.hbm_to_vmem [thread:$0]  %s286_s0, 256, %s20_s10, [#allocation4], %s224_s19, %s224_s19, %s225_s20  }
  0x13   :  { %s226_s23 = smov [#allocation6]   ;;  %s173_s27 = scalar_lea.hbm %s287_s1, 256 }
  0x14   :  { %s35_s24 = sshll.u32 %s226_s23, 4  ;;  %p174_p8 = scmp.ne.s32.totalorder %s287_s1, %s173_s27  ;;  %s36_s24 = int_to_ptr.vmem [resolvable:$true] %s35_s24 }
  0x15   :  { %p177_p9 = scmp.lt.u32.totalorder %s173_s27, %s287_s1 }
  0x17   :  { %p179_p10 = pnand %p177_p9, %p174_p8 }
  0x19   :  { %182 = shalt.err (!%p179_p10)
}
  0x1a   :  { %s183_s4 = scalar_lea.vmem %s36_s24, 256  ;;  %p188_p12 = scmp.lt.s32.totalorder %s36_s24, %s36_s24 }
  0x1b   :  { %p184_p11 = scmp.ne.s32.totalorder %s36_s24, %s183_s4  ;;  %p189_p13 = scmp.lt.s32.totalorder %s183_s4, %s183_s4 }
  0x1d   :  { %p190_p0 = por %p189_p13, %p188_p12 }
  0x1f   :  { %p191_p1 = pnand %p190_p0, %p184_p11 }
  0x21   :  { %194 = shalt.err (!%p191_p1)
}
  0x22   :  { %41 = dma.hbm_to_vmem [thread:$0]  %s287_s1, 256, %s36_s24, [#allocation7], %s224_s19, %s224_s19, %s225_s20  }
  0x23   :  { %217 = dma.done.wait [#allocation4], 256  }
  0x24   :  { %218 = vsyncadd [#allocation4], 4294967040 }
  0x25   :  { %219 = dma.done.wait [#allocation7], 256  }
  0x26   :  { %220 = vsyncadd [#allocation7], 4294967040  ;;  %v59_v0 = vld [vmem:[#allocation6] sm:$0xff]  ;;  %v60_v1 = vld [vmem:[#allocation6 + $0x8] sm:$0xff]  ;;  %vm56_vm0 = vcmask 7168   ;;  %v227_v20 = vmov 0.0  }
  0x27   :  { %v63_v2 = vand.u32 2147483647, %v59_v0  ;;  %v64_v3 = vand.u32 2147483647, %v60_v1  ;;  %v61_v8 = vld [vmem:[#allocation3] sm:$0xff]  ;;  %v62_v12 = vld [vmem:[#allocation3 + $0x8] sm:$0xff] }
  0x28   :  { %v75_v11 = vsub.f32 %v59_v0, %v61_v8  ;;  %v76_v14 = vsub.f32 %v60_v1, %v62_v12  ;;  %57 = vst.msk [vmem:[#allocation2] sm:$0xff] %vm56_vm0, %v227_v20  ;;  %58 = vst.msk [vmem:[#allocation2 + $0x8] sm:$0xff] %vm56_vm0, %v227_v20  ;;  %s228_s1 = smov [#allocation8]  }
  0x29   :  { %65 = vmax.xlane.f32.xlu0 %v63_v2  ;;  %s125_s6 = sshll.u32 %s228_s1, 4  ;;  %s126_s6 = int_to_ptr.vmem [resolvable:$true] %s125_s6 }
  0x2a   :  { %v77_v13 = vmul.f32 %v75_v11, %v75_v11  ;;  %v78_v17 = vmul.f32 %v76_v14, %v76_v14  ;;  %s195_s8 = scalar_lea.vmem %s126_s6, 128  ;;  %p200_p3 = scmp.lt.s32.totalorder %s126_s6, %s126_s6 }
  0x2b   :  { %p196_p2 = scmp.ne.s32.totalorder %s126_s6, %s195_s8  ;;  %p201_p4 = scmp.lt.s32.totalorder %s195_s8, %s195_s8 }
  0x2d   :  { %67 = vmax.xlane.f32.xlu0 %v64_v3  ;;  %p202_p5 = por %p201_p4, %p200_p3 }
  0x2f   :  { %v93_v25 = vld [vmem:[#allocation2] sm:$0xff]  ;;  %v94_v30 = vld [vmem:[#allocation2 + $0x8] sm:$0xff]  ;;  %p203_p6 = pnand %p202_p5, %p196_p2 }
  0xb6   :  { %v66_v4 = vpop.xlane.xlu0 %65 }
  0xb7   :  { %v69_v5 = vsub.f32 %v63_v2, %v66_v4 }
  0xb9   :  { %v71_v6 = vmul.f32 1.442695, %v69_v5 }
  0xba   :  { %v68_v7 = vpop.xlane.xlu0 %67 }
  0xbb   :  { %143 = vpow2.f32 %v71_v6  ;;  %v70_v9 = vsub.f32 %v64_v3, %v68_v7 }
  0xbd   :  { %v73_v10 = vmul.f32 1.442695, %v70_v9 }
  0xbf   :  { %145 = vpow2.f32 %v73_v10 }
  0xc5   :  { %v144_v15 = vpop.eup %143 }
  0xc6   :  { %85 = vadd.xlane.f32.xlu1 %v144_v15  ;;  %v79_v16 = vmul.f32 %v144_v15, %v77_v13 }
  0xc8   :  { %81 = vadd.xlane.f32.xlu0 %v79_v16 }
  0xc9   :  { %v146_v18 = vpop.eup %145 }
  0xca   :  { %87 = vadd.xlane.f32.xlu1 %v146_v18  ;;  %v80_v19 = vmul.f32 %v146_v18, %v78_v17 }
  0xce   :  { %83 = vadd.xlane.f32.xlu1 %v80_v19 }
 0x153   :  { %v86_v21 = vpop.xlane.xlu1 %85 }
 0x154   :  { %147 = vrcp.f32 %v86_v21 }
 0x155   :  { %v82_v24 = vpop.xlane.xlu0 %81 }
 0x157   :  { %v88_v22 = vpop.xlane.xlu1 %87 }
 0x158   :  { %149 = vrcp.f32 %v88_v22 }
 0x15b   :  { %v84_v29 = vpop.xlane.xlu1 %83 }
 0x15e   :  { %v148_v23 = vpop.eup %147 }
 0x15f   :  { %v90_v26 = vmul.f32 %v148_v23, %v82_v24 }
 0x161   :  { %v95_v27 = vadd.f32 %v93_v25, %v90_v26 }
 0x162   :  { %v150_v28 = vpop.eup %149 }
 0x163   :  { %98 = vst.msk [vmem:[#allocation2] sm:$0xff] %vm56_vm0, %v95_v27  ;;  %v92_v31 = vmul.f32 %v150_v28, %v84_v29 }
 0x165   :  { %v96_v32 = vadd.f32 %v94_v30, %v92_v31 }
 0x167   :  { %99 = vst.msk [vmem:[#allocation2 + $0x8] sm:$0xff] %vm56_vm0, %v96_v32 }
 0x16a   :  { %v103_v33 = vld [vmem:[#allocation2] sm:$0xff] }
 0x16b   :  { %v105_v35 = vsel %vm56_vm0, %v103_v33, 0.0 }
 0x16e   :  { %v104_v34 = vld [vmem:[#allocation2 + $0x8] sm:$0xff] }
 0x16f   :  { %v106_v36 = vsel %vm56_vm0, %v104_v34, 0.0 }
 0x170   :  { %v107_v37 = vadd.f32 %v106_v36, %v105_v35 }
 0x172   :  { %108 = vadd.xlane.f32.xlu0 %v107_v37 }
 0x1ff   :  { %v109_v38 = vpop.xlane.xlu0 %108 }
 0x200   :  { %v110_v39 = vrot.slane %v109_v38, 4 }
 0x202   :  { %v111_v40 = vadd.f32 %v110_v39, %v109_v38 }
 0x204   :  { %v112_v41 = vrot.slane %v111_v40, 2 }
 0x206   :  { %v113_v42 = vadd.f32 %v112_v41, %v111_v40 }
 0x208   :  { %v114_v43 = vrot.slane %v113_v42, 1 }
 0x20a   :  { %v115_v44 = vadd.f32 %v114_v43, %v113_v42 }
 0x20c   :  { %135 = vpush %v115_v44 }
 0x23d   :  { %s136_s7 = spop %135 }
 0x23e   :  { %v117_v45 = vstv %s136_s7 }
 0x23f   :  { %118 = vst [vmem:[#allocation8] sm:$0xff] %v117_v45 }
 0x240   :  { %206 = shalt.err (!%p203_p6)
}
 0x241   :  { %s207_s11 = scalar_lea.hbm %s288_s2, 128 }
 0x242   :  { %p208_p7 = scmp.ne.s32.totalorder %s288_s2, %s207_s11  ;;  %p211_p8 = scmp.lt.u32.totalorder %s207_s11, %s288_s2 }
 0x244   :  { %p213_p9 = pnand %p211_p8, %p208_p7 }
 0x246   :  { %216 = shalt.err (!%p213_p9)
}
 0x247   :  { %128 = dma.vmem_to_hbm [thread:$0]  %s126_s6, 128, %s288_s2, [#allocation5]  }
 0x248   :  { %221 = dma.done.wait [#allocation5], 128  }
 0x249   :  { %222 = vsyncadd [#allocation5], 4294967168 }
 0x24a   :  { %132 = vsyncpa [#allocation4], 1 }
 0x24b   :  { %133 = vsyncpa [#allocation7], 1 }
 0x24c   :  { %134 = vsyncpa [#allocation5], 1 }

</bundles_post_ra>
